<compile_context>
chip_gen: v6e
topology: v6e:2x2x1
jax: 0.10.0
libtpu: 0.0.40
codegen_flags: <defaults>
</compile_context>

<pallas_src>
import jax
import jax.numpy as jnp
from math import sqrt
from jax.experimental import pallas as pl
from jax.experimental.pallas import tpu as pltpu


def _round_up(x, mult):
    return ((x + mult - 1) // mult) * mult


def prepare_params(W, V, b):
    """Pad parameters to a lane-dense hidden dim (multiple of 128), ONCE.

    Returns Wp (n, Mp), Vp (Mp, Mp), bp (1, Mp). Padding is zeros, so the
    math is exact; padded output columns come out as tanh(0) = 0 and never
    feed back (padded V rows/cols are zero).
    """
    n, m = W.shape
    Mp = _round_up(m, 128)
    Wp = jnp.pad(W, ((0, 0), (0, Mp - m)))
    Vp = jnp.pad(V, ((0, Mp - m), (0, Mp - m)))
    bp = jnp.pad(b, (0, Mp - m))[None, :]
    return Wp, Vp, bp


# ---------------------------------------------------------------------------
# Single-step cell (matches the PyTorch module's forward exactly)
# ---------------------------------------------------------------------------
def basic_rnn_cell(x, h, Wp, Vp, bp):
    """h_new = tanh(b + x @ W + h @ V).  x: (B, n), h: (B, m) -> (B, m)."""
    B, _ = x.shape
    m = h.shape[1]
    Mp = Wp.shape[1]

    def kernel(x_ref, h_ref, w_ref, v_ref, b_ref, o_ref):
        # Two MXU matmuls with f32 accumulation, free VPU bias add, EUP tanh.
        a = jnp.dot(x_ref[...], w_ref[...], preferred_element_type=jnp.float32)
        a = a + jnp.dot(h_ref[...], v_ref[0:m, :],
                        preferred_element_type=jnp.float32)
        a = a + b_ref[...]
        o_ref[...] = jnp.tanh(a).astype(o_ref.dtype)

    out = pl.pallas_call(
        kernel,
        out_shape=jax.ShapeDtypeStruct((B, Mp), x.dtype),
        in_specs=[pl.BlockSpec(memory_space=pltpu.MemorySpace.VMEM)] * 5,
        out_specs=pl.BlockSpec(memory_space=pltpu.MemorySpace.VMEM),
    )(x, h, Wp, Vp, bp)

    return out[:, :m]


# ---------------------------------------------------------------------------
# Sequence driver: time loop hoisted into the kernel (one launch, one weight
# DMA for the whole sequence; h carried in VMEM scratch).
# ---------------------------------------------------------------------------
def _rnn_seq_kernel(x_ref, h0_ref, w_ref, v_ref, b_ref, hs_ref, h_scr):
    @pl.when(pl.program_id(0) == 0)
    def _():
        h_scr[...] = h0_ref[...]

    a = jnp.dot(x_ref[0], w_ref[...], preferred_element_type=jnp.float32)
    a = a + jnp.dot(h_scr[...], v_ref[...], preferred_element_type=jnp.float32)
    a = a + b_ref[...]
    h_new = jnp.tanh(a)
    h_scr[...] = h_new
    hs_ref[0] = h_new.astype(hs_ref.dtype)


def basic_rnn_sequence(xs, h0, Wp, Vp, bp):
    """Run the cell over xs: (T, B, n) with initial h0: (B, m) -> (T, B, m)."""
    T, B, n = xs.shape
    m = h0.shape[1]
    Mp = Wp.shape[1]

    # One-time (per sequence, not per step) pad of the initial hidden state.
    h0p = jnp.pad(h0, ((0, 0), (0, Mp - m))).astype(jnp.float32)

    hs = pl.pallas_call(
        _rnn_seq_kernel,
        out_shape=jax.ShapeDtypeStruct((T, B, Mp), xs.dtype),
        grid=(T,),
        in_specs=[
            pl.BlockSpec((1, B, n), lambda t: (t, 0, 0)),    # x_t, pipelined
            pl.BlockSpec((B, Mp), lambda t: (0, 0)),         # h0, resident
            pl.BlockSpec((n, Mp), lambda t: (0, 0)),         # W, resident
            pl.BlockSpec((Mp, Mp), lambda t: (0, 0)),        # V, resident
            pl.BlockSpec((1, Mp), lambda t: (0, 0)),         # b, resident
        ],
        out_specs=pl.BlockSpec((1, B, Mp), lambda t: (t, 0, 0)),
        scratch_shapes=[pltpu.VMEM((B, Mp), jnp.float32)],   # h carry
        compiler_params=pltpu.CompilerParams(
            dimension_semantics=("arbitrary",)),
    )(xs, h0p, Wp, Vp, bp)

    # Single slice at the end of the sequence (not per step).
    return hs[:, :, :m]


if __name__ == "__main__":
    vocab_size = 16   # n: number of input features
    hidden_size = 32  # m: hidden units
    batch = 8         # B
    seq_len = 8       # T (for the sequence-driver check)

    key = jax.random.PRNGKey(0)
    kx, kh, kw, kv, kb, ks = jax.random.split(key, 6)

    k = sqrt(1.0 / hidden_size)
    W = jax.random.uniform(kw, (vocab_size, hidden_size), jnp.float32,
                           minval=-k, maxval=k)
    V = jax.random.uniform(kv, (hidden_size, hidden_size), jnp.float32,
                           minval=-k, maxval=k)
    b = jax.random.uniform(kb, (hidden_size,), jnp.float32, minval=-k, maxval=k)

    x = jax.random.normal(kx, (batch, vocab_size), jnp.float32)
    h = jax.random.normal(kh, (batch, hidden_size), jnp.float32)
    xs = jax.random.normal(ks, (seq_len, batch, vocab_size), jnp.float32)

    # Parameter padding hoisted out of the per-step path (built once, reused).
    Wp, Vp, bp = prepare_params(W, V, b)

    # ---- single-step forward (module semantics) ----
    h_new = basic_rnn_cell(x, h, Wp, Vp, bp)
    jax.block_until_ready(h_new)
    ref = jnp.tanh(b + x @ W + h @ V)
    assert h_new.shape == ref.shape, "shape mismatch vs reference"
    assert jnp.allclose(h_new, ref, atol=1e-5, rtol=1e-5), "mismatch vs reference"

    # ---- sequence driver (time loop inside one kernel) ----
    hs = basic_rnn_sequence(xs, h, Wp, Vp, bp)
    jax.block_until_ready(hs)
    ref_h = h
    ref_list = []
    for t in range(seq_len):
        ref_h = jnp.tanh(b + xs[t] @ W + ref_h @ V)
        ref_list.append(ref_h)
    ref_hs = jnp.stack(ref_list)
    assert hs.shape == ref_hs.shape, "sequence shape mismatch vs reference"
    assert jnp.allclose(hs, ref_hs, atol=1e-5, rtol=1e-5), "sequence mismatch vs reference"

    print("KERNEL_OK")
</pallas_src>

<mosaic_0001>
module attributes {stable_mosaic.version = 11 : i64} {
  func.func @kernel(%arg0: memref<8x16xf32, #tpu.memory_space<vmem>>, %arg1: memref<8x32xf32, #tpu.memory_space<vmem>>, %arg2: memref<16x128xf32, #tpu.memory_space<vmem>>, %arg3: memref<128x128xf32, #tpu.memory_space<vmem>>, %arg4: memref<1x128xf32, #tpu.memory_space<vmem>>, %arg5: memref<8x128xf32, #tpu.memory_space<vmem>>) attributes {dimension_semantics = [], scalar_prefetch = 0 : i64, scratch_operands = 0 : i64, tpu.core_type = #tpu.core_type<tc>} {
    %c0 = arith.constant 0 : index
    %c0_0 = arith.constant 0 : index
    %0 = vector.load %arg0[%c0, %c0_0] : memref<8x16xf32, #tpu.memory_space<vmem>>, vector<8x16xf32>
    %c0_1 = arith.constant 0 : index
    %c0_2 = arith.constant 0 : index
    %1 = vector.load %arg2[%c0_1, %c0_2] : memref<16x128xf32, #tpu.memory_space<vmem>>, vector<16x128xf32>
    %cst = arith.constant dense<0.000000e+00> : vector<8x128xf32>
    %2 = tpu.matmul %0, %1, %cst {dimension_numbers = #tpu.dot_dimension_numbers<[1], [0], [0], [1], [0, 0, 1, 1], [], []>} : vector<8x16xf32>, vector<16x128xf32>, vector<8x128xf32> -> vector<8x128xf32>
    %c0_3 = arith.constant 0 : index
    %c0_4 = arith.constant 0 : index
    %3 = vector.load %arg1[%c0_3, %c0_4] : memref<8x32xf32, #tpu.memory_space<vmem>>, vector<8x32xf32>
    %c0_5 = arith.constant 0 : index
    %c0_6 = arith.constant 0 : index
    %4 = vector.load %arg3[%c0_5, %c0_6] : memref<128x128xf32, #tpu.memory_space<vmem>>, vector<32x128xf32>
    %cst_7 = arith.constant dense<0.000000e+00> : vector<8x128xf32>
    %5 = tpu.matmul %3, %4, %cst_7 {dimension_numbers = #tpu.dot_dimension_numbers<[1], [0], [0], [1], [0, 0, 1, 1], [], []>} : vector<8x32xf32>, vector<32x128xf32>, vector<8x128xf32> -> vector<8x128xf32>
    %6 = arith.addf %2, %5 : vector<8x128xf32>
    %c0_8 = arith.constant 0 : index
    %c0_9 = arith.constant 0 : index
    %7 = vector.load %arg4[%c0_8, %c0_9] : memref<1x128xf32, #tpu.memory_space<vmem>>, vector<1x128xf32>
    %8 = vector.broadcast %7 : vector<1x128xf32> to vector<8x128xf32>
    %9 = arith.addf %6, %8 : vector<8x128xf32>
    %10 = math.tanh %9 : vector<8x128xf32>
    %c0_10 = arith.constant 0 : index
    %c0_11 = arith.constant 0 : index
    %11 = vector.load %arg5[%c0_10, %c0_11] : memref<8x128xf32, #tpu.memory_space<vmem>>, vector<8x128xf32>
    tpu.vector_store %arg5[%c0_10, %c0_11], %10 {strides = array<i32>} : memref<8x128xf32, #tpu.memory_space<vmem>>, vector<8x128xf32>,
    return
  }
}

</mosaic_0001>

<bundles_post_ra>
// kernel: tpu_custom_call.1
= control target key start
LH: loop header
LB: loop body
LE: loop exit
PB: predicated region body
PF: predicated region fallthrough
CT: control target
= control target key end

     0   :  { %10 = vsyncpa [#allocation3], 0  ;;  %s460_s0 = inlined_call_operand.hbm [shape: f32[8,16], index: 0, kind: input, shape index: {}]   ;;  %s461_s1 = inlined_call_operand.hbm [shape: f32[8,32], index: 1, kind: input, shape index: {}]   ;;  %s462_s2 = inlined_call_operand.hbm [shape: f32[16,128], index: 2, kind: input, shape index: {}]   ;;  %s463_s3 = inlined_call_operand.hbm [shape: f32[128,128], index: 3, kind: input, shape index: {}]   ;;  %s464_s4 = inlined_call_operand.vmem [shape: f32[1,128], index: 4, kind: input, shape index: {}]   ;;  %s465_s5 = inlined_call_operand.hbm [shape: f32[8,128], index: 5, kind: output, shape index: {}]  }
   0x1   :  { %11 = vsyncpa [#allocation6], 0 }
   0x2   :  { %12 = vsyncpa [#allocation9], 0 }
   0x3   :  { %13 = vsyncpa [#allocation4], 0  ;;  %s403_s18 = smov [#allocation5]   ;;  %s404_s20 = smov [#allocation2]  }
   0x4   :  { %s30_s19 = sshll.u32 %s403_s18, 4  ;;  %s20_s21 = sshll.u32 %s404_s20, 4  ;;  %s31_s19 = int_to_ptr.vmem [resolvable:$true] %s30_s19  ;;  %s21_s21 = int_to_ptr.vmem [resolvable:$true] %s20_s21 }
   0x5   :  { %s303_s22 = scalar_lea.vmem %s31_s19, 128  ;;  %p308_p1 = scmp.lt.s32.totalorder %s31_s19, %s31_s19 }
   0x6   :  { %p304_p0 = scmp.ne.s32.totalorder %s31_s19, %s303_s22  ;;  %p309_p2 = scmp.lt.s32.totalorder %s303_s22, %s303_s22 }
   0x8   :  { %p310_p3 = por %p309_p2, %p308_p1 }
   0xa   :  { %p311_p4 = pnand %p310_p3, %p304_p0 }
   0xc   :  { %314 = shalt.err (!%p311_p4)
}
   0xd   :  { %33 = dma.hbm_to_vmem [thread:$0]  %s461_s1, 128, %s31_s19, [#allocation6]  }
   0xe   :  { %s323_s25 = scalar_lea.vmem %s21_s21, 128  ;;  %p328_p6 = scmp.lt.s32.totalorder %s21_s21, %s21_s21 }
   0xf   :  { %p324_p5 = scmp.ne.s32.totalorder %s21_s21, %s323_s25  ;;  %p329_p7 = scmp.lt.s32.totalorder %s323_s25, %s323_s25 }
  0x11   :  { %p330_p8 = por %p329_p7, %p328_p6 }
  0x13   :  { %p331_p9 = pnand %p330_p8, %p324_p5 }
  0x15   :  { %334 = shalt.err (!%p331_p9)
}
  0x16   :  { %23 = dma.hbm_to_vmem [thread:$0]  %s460_s0, 128, %s21_s21, [#allocation3]  }
  0x17   :  { %s405_s28 = smov [#allocation7]  }
  0x18   :  { %s39_s29 = sshll.u32 %s405_s28, 4  ;;  %s40_s29 = int_to_ptr.vmem [resolvable:$true] %s39_s29 }
  0x19   :  { %s343_s30 = scalar_lea.vmem %s40_s29, 256  ;;  %p348_p11 = scmp.lt.s32.totalorder %s40_s29, %s40_s29 }
  0x1a   :  { %p344_p10 = scmp.ne.s32.totalorder %s40_s29, %s343_s30  ;;  %p349_p12 = scmp.lt.s32.totalorder %s343_s30, %s343_s30 }
  0x1c   :  { %p350_p13 = por %p349_p12, %p348_p11 }
  0x1e   :  { %p351_p0 = pnand %p350_p13, %p344_p10 }
  0x20   :  { %354 = shalt.err (!%p351_p0)
}
  0x21   :  { %s406_s1 = smov 128   ;;  %s407_s6 = smov 8  }
  0x22   :  { %45 = dma.hbm_to_vmem [thread:$0]  %s462_s2, 256, %s40_s29, [#allocation6], %s406_s1, %s406_s1, %s407_s6  }
  0x23   :  { %s408_s9 = smov [#allocation8]  }
  0x24   :  { %s51_s10 = sshll.u32 %s408_s9, 4  ;;  %s52_s10 = int_to_ptr.vmem [resolvable:$true] %s51_s10 }
  0x25   :  { %s363_s0 = scalar_lea.vmem %s52_s10, 2048  ;;  %p368_p2 = scmp.lt.s32.totalorder %s52_s10, %s52_s10 }
  0x26   :  { %p364_p1 = scmp.ne.s32.totalorder %s52_s10, %s363_s0  ;;  %p369_p3 = scmp.lt.s32.totalorder %s363_s0, %s363_s0 }
  0x28   :  { %p370_p4 = por %p369_p3, %p368_p2 }
  0x2a   :  { %p371_p5 = pnand %p370_p4, %p364_p1 }
  0x2c   :  { %374 = shalt.err (!%p371_p5)
}
  0x2d   :  { %57 = dma.hbm_to_vmem [thread:$0]  %s463_s3, 2048, %s52_s10, [#allocation9], %s406_s1, %s406_s1, %s407_s6  }
  0x2e   :  { %395 = dma.done.wait [#allocation3], 128  }
  0x2f   :  { %396 = vsyncadd [#allocation3], 4294967168 }
  0x30   :  { %397 = dma.done.wait [#allocation6], 384  }
  0x31   :  { %398 = vsyncadd [#allocation6], 4294966912 }
  0x32   :  { %399 = dma.done.wait [#allocation9], 2048  }
  0x33   :  { %400 = vsyncadd [#allocation9], 4294965248  ;;  %v409_v0 = vmov 0.0   ;;  %vm410_vm0 = vmmov 0   ;;  %v79_v1 = vld [vmem:[#allocation8 + $0x18] sm:$0xff]  ;;  %v78_v2 = vld [vmem:[#allocation8 + $0x10] sm:$0xff] }
  0x34   :  { %266 = vmatprep.subr.mxu0 %v409_v0  ;;  %277 = vmatprep.subr.mxu1 %v409_v0  ;;  %v74_v3 = vld [vmem:[#allocation7 + $0x8] sm:$0xff]  ;;  %v73_v4 = vld [vmem:[#allocation7] sm:$0xff]  ;;  %v72_v5 = vld [vmem:[#allocation2] sm:$0xff]  ;;  %vm154_vm1 = vcmask 130048   ;;  %vm80_vm2 = vcmask 261120   ;;  %s411_s13 = smov [#allocation10]  }
  0x35   :  { %281 = vmatprep.mubr.msk.f32.mxu1 %vm410_vm0, %v409_v0  ;;  %274 = vmatprep.mubr.msk.f32.mxu0 %vm410_vm0, %v409_v0  ;;  %v77_v6 = vld [vmem:[#allocation8 + $0x8] sm:$0xff]  ;;  %v76_v7 = vld [vmem:[#allocation8] sm:$0xff]  ;;  %s244_s14 = sshll.u32 %s411_s13, 4  ;;  %s245_s14 = int_to_ptr.vmem [resolvable:$true] %s244_s14 }
  0x36   :  { %267 = vmatpush3.msra.mxu0 %v79_v1  ;;  %278 = vmatpush3.msra.mxu1 %v74_v3  ;;  %v75_v8 = vld [vmem:[#allocation5] sm:$0xff]  ;;  %v257_v12 = vld [vmem:[%s464_s4] ss:$0 sm:$0xff]  ;;  %s375_s15 = scalar_lea.vmem %s245_s14, 128  ;;  %p380_p7 = scmp.lt.s32.totalorder %s245_s14, %s245_s14 }
  0x37   :  { %268 = vmatprep.subr.mxu0 %v409_v0  ;;  %279 = vmatprep.subr.mxu1 %v409_v0  ;;  %p376_p6 = scmp.ne.s32.totalorder %s245_s14, %s375_s15  ;;  %p381_p8 = scmp.lt.s32.totalorder %s375_s15, %s375_s15 }
  0x38   :  { %269 = vmatpush3.msra.mxu0 %v78_v2  ;;  %280 = vmatpush3.msra.mxu1 %v73_v4 }
  0x39   :  { %270 = vmatprep.subr.mxu0 %v409_v0  ;;  %282 = vmatmul.mubr.msk.f32.vlgmr.msra.gmra.mxu1 %vm154_vm1, %v72_v5  ;;  %p382_p9 = por %p381_p8, %p380_p7 }
  0x3a   :  { %271 = vmatpush3.msra.mxu0 %v77_v6 }
  0x3b   :  { %272 = vmatprep.subr.mxu0 %v409_v0  ;;  %p383_p10 = pnand %p382_p9, %p376_p6 }
  0x3c   :  { %273 = vmatpush3.msra.mxu0 %v76_v7 }
  0x3d   :  { %275 = vmatmul.mubr.msk.f32.vlgmr.msra.gmra.mxu0 %vm80_vm2, %v75_v8 }
  0xf9   :  { %v224_v9 = vpop.f32.mrf.mxu1 }
  0xfb   :  { %v283_v10 = vpop.f32.mrf.mxu1 }
  0xfd   :  { %v150_v11 = vpop.f32.mrf.mxu0 }
  0xfe   :  { %v225_v13 = vadd.f32 %v224_v9, %v150_v11 }
  0xff   :  { %v276_v14 = vpop.f32.mrf.mxu0 }
 0x100   :  { %v235_v15 = vadd.f32 %v257_v12, %v225_v13 }
 0x102   :  { %293 = vtanh.f32 %v235_v15 }
 0x10f   :  { %v294_v16 = vpop.eup %293 }
 0x110   :  { %237 = vst [vmem:[#allocation10] sm:$0xff] %v294_v16 }
 0x111   :  { %386 = shalt.err (!%p383_p10)
}
 0x112   :  { %247 = dma.vmem_to_hbm [thread:$0]  %s245_s14, 128, %s465_s5, [#allocation4]  }
 0x113   :  { %401 = dma.done.wait [#allocation4], 128  }
 0x114   :  { %402 = vsyncadd [#allocation4], 4294967168 }
 0x115   :  { %251 = vsyncpa [#allocation3], 1 }
 0x116   :  { %252 = vsyncpa [#allocation6], 1 }
 0x117   :  { %253 = vsyncpa [#allocation9], 1 }
 0x118   :  { %254 = vsyncpa [#allocation4], 1 }

</bundles_post_ra>
